<compile_context>
chip_gen: v6e
topology: v6e:2x2x1
jax: 0.10.0
libtpu: 0.0.40
codegen_flags: <defaults>
</compile_context>

<pallas_src>
import functools

import jax
import jax.numpy as jnp
import numpy as np
from jax import lax
from jax.experimental import pallas as pl
from jax.experimental.pallas import tpu as pltpu


def lstmgc_kernel(x_ref, wg_ref, bg_ref, w1_ref, b1_ref, w2_ref, b2_ref,
                  out_ref, *, vh):
    # One fused gate matmul: (B, V*lag) @ (V*lag, 2*V*H) -> (B, 2*V*H)
    gates = jnp.dot(x_ref[...], wg_ref[...],
                    preferred_element_type=jnp.float32) + bg_ref[...]

    i_g = jax.nn.sigmoid(gates[:, :vh])      # lane-aligned split (vh = V*H = 128)
    g_g = jnp.tanh(gates[:, vh:])
    c = i_g * g_g                            # (B, V*H); imp weights folded into W1

    # MLP: relu(c @ W1s + b1) @ W2 + b2  (weights pre-transposed to (K, N) layout)
    h1 = jnp.maximum(
        jnp.dot(c, w1_ref[...], preferred_element_type=jnp.float32) + b1_ref[...],
        0.0)
    out_ref[...] = (jnp.dot(h1, w2_ref[...], preferred_element_type=jnp.float32)
                    + b2_ref[...])


def _pack_params(params, num_vars, lag, hidden_lstm):
    """One-time (per model) weight packing done in plain JAX outside the kernel."""
    V, H = num_vars, hidden_lstm
    VH = V * H

    w_ih = params["w_ih"].astype(jnp.float32)                      # (V, 4H, lag)
    bias = (params["b_ih"] + params["b_hh"]).astype(jnp.float32)   # (V, 4H); h0=0 => W_hh only contributes b_hh

    # PyTorch LSTMCell gate row order: [i, f, g, o]. Only i and g are live.
    w_i = w_ih[:, 0 * H:1 * H, :]                                  # (V, H, lag)
    w_g = w_ih[:, 2 * H:3 * H, :]
    b_i = bias[:, 0 * H:1 * H].reshape(VH)
    b_g = bias[:, 2 * H:3 * H].reshape(VH)

    eye = jnp.eye(V, dtype=jnp.float32)

    def block_diag(w):  # (V, H, lag) -> (V*lag, V*H); block (v, v) holds w[v].T
        blk = jnp.einsum('vu,vhl->vluh', eye, w)                   # (V, lag, V, H)
        return blk.reshape(V * lag, VH)

    w_gates = jnp.concatenate([block_diag(w_i), block_diag(w_g)], axis=1)  # (V*lag, 2*V*H)
    b_gates = jnp.concatenate([b_i, b_g])[None, :]                          # (1, 2*V*H)

    # Fold imp_weights into W1's input columns: (c*imp) @ W1^T == c @ (W1*imp)^T.
    imp_cols = jnp.repeat(params["imp"].astype(jnp.float32), H)             # (V*H,)
    w1_scaled = params["w1"].astype(jnp.float32) * imp_cols[None, :]        # (M, V*H)

    return dict(
        w_gates=w_gates,
        b_gates=b_gates,
        w1=w1_scaled.T,                                           # (V*H, M)
        b1=params["b1"].astype(jnp.float32)[None, :],             # (1, M)
        w2=params["w2"].astype(jnp.float32).T,                    # (M, num_outputs)
        b2=params["b2"].astype(jnp.float32)[None, :],             # (1, num_outputs)
    )


def lstmgc_forward(inputs, params):
    """inputs: (B, V, S, D) float32; params: dict of weights (PyTorch layout)."""
    B, V, S, D = inputs.shape
    lag = S * D
    H = params["w_ih"].shape[1] // 4
    VH = V * H
    num_outputs = params["w2"].shape[0]

    packed = _pack_params(params, V, lag, H)

    # Flatten (V, S, D) -> V*lag row-major: per-variable .view(B, -1) concatenated
    # along features == a contiguous reshape.
    x = inputs.reshape(B, V * lag).astype(jnp.float32)            # (B, V*lag)

    kernel = functools.partial(lstmgc_kernel, vh=VH)
    vmem = pl.BlockSpec(memory_space=pltpu.MemorySpace.VMEM)

    return pl.pallas_call(
        kernel,
        out_shape=jax.ShapeDtypeStruct((B, num_outputs), jnp.float32),
        in_specs=[vmem,   # x        (B, V*lag)
                  vmem,   # w_gates  (V*lag, 2*V*H)  block-diag packed i|g weights
                  vmem,   # b_gates  (1, 2*V*H)
                  vmem,   # w1       (V*H, M)        imp-scaled, pre-transposed
                  vmem,   # b1       (1, M)
                  vmem,   # w2       (M, num_outputs) pre-transposed
                  vmem],  # b2       (1, num_outputs)
        out_specs=vmem,
        # Generous scoped-VMEM limit; total resident footprint here is <1 MiB.
        compiler_params=pltpu.CompilerParams(vmem_limit_bytes=32 * 1024 * 1024),
    )(x, packed["w_gates"], packed["b_gates"], packed["w1"], packed["b1"],
      packed["w2"], packed["b2"])


def lstmgc_reference(inputs, params):
    """Pure-JAX reference reproducing the FULL PyTorch forward (unpruned math)."""
    B, V, S, D = inputs.shape
    H = params["w_ih"].shape[1] // 4
    x = inputs.reshape(B, V, S * D)
    h0 = jnp.zeros((B, H), jnp.float32)
    c0 = jnp.zeros((B, H), jnp.float32)
    agg = []
    for v in range(V):
        gates = (x[:, v] @ params["w_ih"][v].T + params["b_ih"][v]
                 + h0 @ params["w_hh"][v].T + params["b_hh"][v])
        i_g = jax.nn.sigmoid(gates[:, 0 * H:1 * H])
        f_g = jax.nn.sigmoid(gates[:, 1 * H:2 * H])
        g_g = jnp.tanh(gates[:, 2 * H:3 * H])
        c_new = f_g * c0 + i_g * g_g
        agg.append(c_new * params["imp"][v])
    agg = jnp.concatenate(agg, axis=1)
    h1 = jax.nn.relu(agg @ params["w1"].T + params["b1"])
    return h1 @ params["w2"].T + params["b2"]


def init_params(key, num_vars, lag, hidden_lstm, hidden_mlp, num_outputs):
    """Deterministic parameter init mirroring the module's __init__/init_weights."""
    ks = jax.random.split(key, 8)
    k_lstm = 1.0 / np.sqrt(hidden_lstm)          # PyTorch LSTMCell default uniform init
    w_ih = jax.random.uniform(ks[0], (num_vars, 4 * hidden_lstm, lag),
                              minval=-k_lstm, maxval=k_lstm, dtype=jnp.float32)
    w_hh = jax.random.uniform(ks[1], (num_vars, 4 * hidden_lstm, hidden_lstm),
                              minval=-k_lstm, maxval=k_lstm, dtype=jnp.float32)
    b_ih = jax.random.uniform(ks[2], (num_vars, 4 * hidden_lstm),
                              minval=-k_lstm, maxval=k_lstm, dtype=jnp.float32)
    b_hh = jax.random.uniform(ks[3], (num_vars, 4 * hidden_lstm),
                              minval=-k_lstm, maxval=k_lstm, dtype=jnp.float32)
    # Linear layers: xavier_normal_ weights, bias filled with 0.1.
    fan1_in, fan1_out = hidden_lstm * num_vars, hidden_mlp
    std1 = np.sqrt(2.0 / (fan1_in + fan1_out))
    w1 = std1 * jax.random.normal(ks[4], (hidden_mlp, fan1_in), dtype=jnp.float32)
    b1 = jnp.full((hidden_mlp,), 0.1, jnp.float32)
    std2 = np.sqrt(2.0 / (hidden_mlp + num_outputs))
    w2 = std2 * jax.random.normal(ks[5], (num_outputs, hidden_mlp), dtype=jnp.float32)
    b2 = jnp.full((num_outputs,), 0.1, jnp.float32)
    # imp_weights = 1/num_vars + N(0, 1e-5)
    imp = (jnp.full((num_vars,), 1.0 / num_vars, jnp.float32)
           + 1e-5 * jax.random.normal(ks[6], (num_vars,), dtype=jnp.float32))
    return dict(w_ih=w_ih, w_hh=w_hh, b_ih=b_ih, b_hh=b_hh,
                w1=w1, b1=b1, w2=w2, b2=b2, imp=imp)


if __name__ == "__main__":
    # Small shapes consistent with the module: lag_max = seq_len * var_dim.
    B, V, S, D = 2, 4, 8, 2
    LAG = S * D            # 16
    H_LSTM = 32            # -> V*H = 128 (lane-dense gate output)
    H_MLP = 32
    N_OUT = 1

    key = jax.random.PRNGKey(0)
    k_in, k_par = jax.random.split(key)
    inputs = jax.random.normal(k_in, (B, V, S, D), dtype=jnp.float32)
    params = init_params(k_par, V, LAG, H_LSTM, H_MLP, N_OUT)

    out = lstmgc_forward(inputs, params)
    out = jax.block_until_ready(out)

    ref = lstmgc_reference(inputs, params)
    np.testing.assert_allclose(np.asarray(out), np.asarray(ref), rtol=1e-5, atol=1e-5)

    print("KERNEL_OK")
</pallas_src>

<mosaic_0001>
module attributes {stable_mosaic.version = 11 : i64} {
  func.func @lstmgc_kernel(%arg0: memref<2x64xf32, #tpu.memory_space<vmem>>, %arg1: memref<64x256xf32, #tpu.memory_space<vmem>>, %arg2: memref<1x256xf32, #tpu.memory_space<vmem>>, %arg3: memref<128x32xf32, #tpu.memory_space<vmem>>, %arg4: memref<1x32xf32, #tpu.memory_space<vmem>>, %arg5: memref<32x1xf32, #tpu.memory_space<vmem>>, %arg6: memref<1x1xf32, #tpu.memory_space<vmem>>, %arg7: memref<2x1xf32, #tpu.memory_space<vmem>>) attributes {dimension_semantics = [], scalar_prefetch = 0 : i64, scratch_operands = 0 : i64, tpu.core_type = #tpu.core_type<tc>} {
    %c0 = arith.constant 0 : index
    %c0_0 = arith.constant 0 : index
    %0 = vector.load %arg0[%c0, %c0_0] : memref<2x64xf32, #tpu.memory_space<vmem>>, vector<2x64xf32>
    %c0_1 = arith.constant 0 : index
    %c0_2 = arith.constant 0 : index
    %1 = vector.load %arg1[%c0_1, %c0_2] : memref<64x256xf32, #tpu.memory_space<vmem>>, vector<64x256xf32>
    %cst = arith.constant dense<0.000000e+00> : vector<2x256xf32>
    %2 = tpu.matmul %0, %1, %cst {dimension_numbers = #tpu.dot_dimension_numbers<[1], [0], [0], [1], [0, 0, 1, 1], [], []>} : vector<2x64xf32>, vector<64x256xf32>, vector<2x256xf32> -> vector<2x256xf32>
    %c0_3 = arith.constant 0 : index
    %c0_4 = arith.constant 0 : index
    %3 = vector.load %arg2[%c0_3, %c0_4] : memref<1x256xf32, #tpu.memory_space<vmem>>, vector<1x256xf32>
    %4 = vector.broadcast %3 : vector<1x256xf32> to vector<2x256xf32>
    %5 = arith.addf %2, %4 : vector<2x256xf32>
    %6 = vector.extract_strided_slice %5 {offsets = [0, 0], sizes = [2, 128], strides = [1, 1]} : vector<2x256xf32> to vector<2x128xf32>
    %7 = arith.negf %6 : vector<2x128xf32>
    %8 = math.exp %7 : vector<2x128xf32>
    %cst_5 = arith.constant 1.000000e+00 : f32
    %9 = vector.broadcast %cst_5 : f32 to vector<2x128xf32>
    %10 = arith.addf %9, %8 : vector<2x128xf32>
    %11 = arith.divf %9, %10 : vector<2x128xf32>
    %12 = vector.extract_strided_slice %5 {offsets = [0, 128], sizes = [2, 128], strides = [1, 1]} : vector<2x256xf32> to vector<2x128xf32>
    %13 = math.tanh %12 : vector<2x128xf32>
    %14 = arith.mulf %11, %13 : vector<2x128xf32>
    %c0_6 = arith.constant 0 : index
    %c0_7 = arith.constant 0 : index
    %15 = vector.load %arg3[%c0_6, %c0_7] : memref<128x32xf32, #tpu.memory_space<vmem>>, vector<128x32xf32>
    %cst_8 = arith.constant dense<0.000000e+00> : vector<2x32xf32>
    %16 = tpu.matmul %14, %15, %cst_8 {dimension_numbers = #tpu.dot_dimension_numbers<[1], [0], [0], [1], [0, 0, 1, 1], [], []>} : vector<2x128xf32>, vector<128x32xf32>, vector<2x32xf32> -> vector<2x32xf32>
    %c0_9 = arith.constant 0 : index
    %c0_10 = arith.constant 0 : index
    %17 = vector.load %arg4[%c0_9, %c0_10] : memref<1x32xf32, #tpu.memory_space<vmem>>, vector<1x32xf32>
    %18 = vector.broadcast %17 : vector<1x32xf32> to vector<2x32xf32>
    %19 = arith.addf %16, %18 : vector<2x32xf32>
    %cst_11 = arith.constant 0.000000e+00 : f32
    %20 = vector.broadcast %cst_11 : f32 to vector<2x32xf32>
    %21 = arith.maximumf %19, %20 : vector<2x32xf32>
    %c0_12 = arith.constant 0 : index
    %c0_13 = arith.constant 0 : index
    %22 = vector.load %arg5[%c0_12, %c0_13] : memref<32x1xf32, #tpu.memory_space<vmem>>, vector<32x1xf32>
    %cst_14 = arith.constant dense<0.000000e+00> : vector<2x1xf32>
    %23 = tpu.matmul %21, %22, %cst_14 {dimension_numbers = #tpu.dot_dimension_numbers<[1], [0], [0], [1], [0, 0, 1, 1], [], []>} : vector<2x32xf32>, vector<32x1xf32>, vector<2x1xf32> -> vector<2x1xf32>
    %c0_15 = arith.constant 0 : index
    %c0_16 = arith.constant 0 : index
    %24 = vector.load %arg6[%c0_15, %c0_16] : memref<1x1xf32, #tpu.memory_space<vmem>>, vector<1x1xf32>
    %25 = vector.broadcast %24 : vector<1x1xf32> to vector<2x1xf32>
    %26 = arith.addf %23, %25 : vector<2x1xf32>
    %c0_17 = arith.constant 0 : index
    %c0_18 = arith.constant 0 : index
    %27 = vector.load %arg7[%c0_17, %c0_18] : memref<2x1xf32, #tpu.memory_space<vmem>>, vector<2x1xf32>
    tpu.vector_store %arg7[%c0_17, %c0_18], %26 {strides = array<i32>} : memref<2x1xf32, #tpu.memory_space<vmem>>, vector<2x1xf32>,
    return
  }
}

</mosaic_0001>

<bundles_post_ra>
// kernel: tpu_custom_call.1
= control target key start
LH: loop header
LB: loop body
LE: loop exit
PB: predicated region body
PF: predicated region fallthrough
CT: control target
= control target key end

     0   :  { %v406_v3 = vmov 0.0   ;;  %vm57_vm0 = vcmask 523264   ;;  %vm407_vm1 = vmmov 0   ;;  %v47_v35 = vlaneseq  ;;  %s594_s1 = inlined_call_operand.vmem [shape: f32[64,256], index: 1, kind: input, shape index: {}]   ;;  %s595_s0 = inlined_call_operand.vmem [shape: f32[2,64], index: 0, kind: input, shape index: {}]   ;;  %s596_s3 = inlined_call_operand.vmem [shape: f32[128,32], index: 3, kind: input, shape index: {}]   ;;  %s597_s5 = inlined_call_operand.vmem [shape: f32[32,1], index: 5, kind: input, shape index: {}]   ;;  %s598_s2 = inlined_call_operand.vmem [shape: f32[1,256], index: 2, kind: input, shape index: {}]   ;;  %s599_s6 = inlined_call_operand.<no memory space> [shape: f32[1,1], index: 6, kind: input, shape index: {}]   ;;  %s600_s4 = inlined_call_operand.vmem [shape: f32[1,32], index: 4, kind: input, shape index: {}]   ;;  %s601_s7 = inlined_call_operand.vmem [shape: f32[2,1], index: 7, kind: output, shape index: {}]  }
   0x1   :  { %v44_v0 = vld [vmem:[%s594_s1 + $0x78] sm:$0xff]  ;;  %v43_v1 = vld [vmem:[%s594_s1 + $0x70] sm:$0xff]  ;;  %v42_v2 = vld [vmem:[%s594_s1 + $0x68] sm:$0xff]  ;;  %125 = vmatprep.mubr.f32.mxu0 %v406_v3  ;;  %352 = vmatprep.subr.mxu1 %v406_v3  ;;  %v12_v55 = vstv %s599_s6  ;;  %vm245_vm2 = vcmask 261120   ;;  %vm319_vm3 = vcmask 1024  }
   0x2   :  { %77 = vmatprep.subr.mxu0 %v44_v0  ;;  %v41_v4 = vld [vmem:[%s594_s1 + $0x60] sm:$0xff]  ;;  %v40_v5 = vld [vmem:[%s594_s1 + $0x58] sm:$0xff]  ;;  %v39_v6 = vld [vmem:[%s594_s1 + $0x50] sm:$0xff]  ;;  %384 = vmatprep.mubr.msk.f32.mxu1 %vm407_vm1, %v406_v3  ;;  %v48_v36 = vshrl.u32 %v47_v35, 7  ;;  %13 = vst [vmem:[#allocation2] sm:$0x1] %v12_v55 }
   0x3   :  { %78 = vmatpush1.msra.mxu0 %v43_v1  ;;  %v38_v7 = vld [vmem:[%s594_s1 + $0x48] sm:$0xff]  ;;  %v37_v8 = vld [vmem:[%s594_s1 + $0x40] sm:$0xff]  ;;  %v36_v9 = vld [vmem:[%s594_s1 + $0x38] sm:$0xff] }
   0x4   :  { %79 = vmatprep.subr.mxu0 %v42_v2  ;;  %v35_v10 = vld [vmem:[%s594_s1 + $0x30] sm:$0xff]  ;;  %v34_v11 = vld [vmem:[%s594_s1 + $0x28] sm:$0xff]  ;;  %v33_v12 = vld [vmem:[%s594_s1 + $0x20] sm:$0xff]  ;;  %v49_v37 = vsub.s32 0, %v48_v36  ;;  %v53_v43 = vsub.s32 1, %v48_v36 }
   0x5   :  { %80 = vmatpush1.msra.mxu0 %v41_v4  ;;  %v32_v13 = vld [vmem:[%s594_s1 + $0x18] sm:$0xff]  ;;  %v31_v14 = vld [vmem:[%s594_s1 + $0x10] sm:$0xff]  ;;  %v30_v15 = vld [vmem:[%s594_s1 + $0x8] sm:$0xff] }
   0x6   :  { %81 = vmatprep.subr.mxu0 %v40_v5  ;;  %v29_v16 = vld [vmem:[%s594_s1] sm:$0xff]  ;;  %v155_v18 = vld [vmem:[%s596_s3 + $0x78] sm:$0xff]  ;;  %v154_v19 = vld [vmem:[%s596_s3 + $0x70] sm:$0xff] }
   0x7   :  { %82 = vmatpush1.msra.mxu0 %v39_v6  ;;  %v28_v17 = vld [vmem:[%s595_s0] sm:$0x3]  ;;  %353 = vmatpush3.msra.mxu1 %v155_v18  ;;  %v153_v20 = vld [vmem:[%s596_s3 + $0x68] sm:$0xff]  ;;  %v151_v22 = vld [vmem:[%s596_s3 + $0x58] sm:$0xff] }
   0x8   :  { %83 = vmatprep.subr.mxu0 %v38_v7  ;;  %354 = vmatprep.subr.mxu1 %v406_v3  ;;  %v152_v21 = vld [vmem:[%s596_s3 + $0x60] sm:$0xff]  ;;  %v150_v23 = vld [vmem:[%s596_s3 + $0x50] sm:$0xff]  ;;  %v149_v24 = vld [vmem:[%s596_s3 + $0x48] sm:$0xff] }
   0x9   :  { %84 = vmatpush1.msra.mxu0 %v37_v8  ;;  %355 = vmatpush3.msra.mxu1 %v154_v19  ;;  %v148_v25 = vld [vmem:[%s596_s3 + $0x40] sm:$0xff]  ;;  %v147_v26 = vld [vmem:[%s596_s3 + $0x38] sm:$0xff]  ;;  %v146_v27 = vld [vmem:[%s596_s3 + $0x30] sm:$0xff] }
   0xa   :  { %85 = vmatprep.subr.mxu0 %v36_v9  ;;  %356 = vmatprep.subr.mxu1 %v406_v3  ;;  %v145_v28 = vld [vmem:[%s596_s3 + $0x28] sm:$0xff]  ;;  %v144_v29 = vld [vmem:[%s596_s3 + $0x20] sm:$0xff]  ;;  %v143_v30 = vld [vmem:[%s596_s3 + $0x18] sm:$0xff] }
   0xb   :  { %86 = vmatpush1.msra.mxu0 %v35_v10  ;;  %357 = vmatpush3.msra.mxu1 %v153_v20  ;;  %v142_v31 = vld [vmem:[%s596_s3 + $0x10] sm:$0xff]  ;;  %v141_v32 = vld [vmem:[%s596_s3 + $0x8] sm:$0xff]  ;;  %v140_v33 = vld [vmem:[%s596_s3] sm:$0xff] }
   0xc   :  { %87 = vmatprep.subr.mxu0 %v34_v11  ;;  %358 = vmatprep.subr.mxu1 %v406_v3  ;;  %v237_v34 = vld [vmem:[%s597_s5 + $0x18] sm:$0xff]  ;;  %v45_v38 = vld [vmem:[%s598_s2] sm:$0x3]  ;;  %v236_v52 = vld [vmem:[%s597_s5 + $0x10] sm:$0xff] }
   0xd   :  { %88 = vmatpush1.msra.mxu0 %v33_v12  ;;  %359 = vmatpush3.msra.mxu1 %v152_v21  ;;  %v50_v39 = vrot.slane %v45_v38, %v49_v37  ;;  %v54_v44 = vrot.slane %v45_v38, %v53_v43  ;;  %v235_v53 = vld [vmem:[%s597_s5 + $0x8] sm:$0xff]  ;;  %v234_v54 = vld [vmem:[%s597_s5] sm:$0xff] }
   0xe   :  { %89 = vmatprep.subr.mxu0 %v32_v13  ;;  %360 = vmatprep.subr.mxu1 %v406_v3  ;;  %v327_v56 = vld [vmem:[%s600_s4] ss:$0 sm:$0xff] }
   0xf   :  { %90 = vmatpush1.msra.mxu0 %v31_v14  ;;  %361 = vmatpush3.msra.mxu1 %v151_v22  ;;  %v328_v61 = vld [vmem:[#allocation2] ss:$0 sm:$0xff] }
  0x10   :  { %91 = vmatprep.subr.mxu0 %v30_v15  ;;  %362 = vmatprep.subr.mxu1 %v406_v3 }
  0x11   :  { %92 = vmatpush1.msra.mxu0 %v29_v16  ;;  %363 = vmatpush3.msra.mxu1 %v150_v23 }
  0x12   :  { %325 = vmatmul.mubr.msk.f32.vlgmr.msra.gmra.mxu0 %vm57_vm0, %v28_v17  ;;  %387 = vmatprep.subr.mxu0 %v406_v3 }
  0x13   :  { %364 = vmatprep.subr.mxu1 %v406_v3  ;;  %395 = vmatprep.mubr.msk.f32.mxu0 %vm407_vm1, %v406_v3 }
  0x14   :  { %365 = vmatpush3.msra.mxu1 %v149_v24  ;;  %388 = vmatpush3.msra.mxu0 %v237_v34 }
  0x15   :  { %366 = vmatprep.subr.mxu1 %v406_v3  ;;  %389 = vmatprep.subr.mxu0 %v406_v3 }
  0x16   :  { %367 = vmatpush3.msra.mxu1 %v148_v25  ;;  %390 = vmatpush3.msra.mxu0 %v236_v52 }
  0x17   :  { %368 = vmatprep.subr.mxu1 %v406_v3  ;;  %391 = vmatprep.subr.mxu0 %v406_v3 }
  0x18   :  { %369 = vmatpush3.msra.mxu1 %v147_v26  ;;  %392 = vmatpush3.msra.mxu0 %v235_v53 }
  0x19   :  { %370 = vmatprep.subr.mxu1 %v406_v3  ;;  %393 = vmatprep.subr.mxu0 %v406_v3 }
  0x1a   :  { %371 = vmatpush3.msra.mxu1 %v146_v27  ;;  %394 = vmatpush3.msra.mxu0 %v234_v54 }
  0x1b   :  { %372 = vmatprep.subr.mxu1 %v406_v3 }
  0x1c   :  { %373 = vmatpush3.msra.mxu1 %v145_v28 }
  0x1d   :  { %374 = vmatprep.subr.mxu1 %v406_v3 }
  0x1e   :  { %375 = vmatpush3.msra.mxu1 %v144_v29 }
  0x1f   :  { %376 = vmatprep.subr.mxu1 %v406_v3 }
  0x20   :  { %377 = vmatpush3.msra.mxu1 %v143_v30 }
  0x21   :  { %378 = vmatprep.subr.mxu1 %v406_v3 }
  0x22   :  { %379 = vmatpush3.msra.mxu1 %v142_v31 }
  0x23   :  { %380 = vmatprep.subr.mxu1 %v406_v3 }
  0x24   :  { %381 = vmatpush3.msra.mxu1 %v141_v32 }
  0x25   :  { %382 = vmatprep.subr.mxu1 %v406_v3 }
  0x26   :  { %383 = vmatpush3.msra.mxu1 %v140_v33 }
  0xd2   :  { %v127_v40 = vpop.f32.mrf.mxu0 }
  0xd3   :  { %v128_v41 = vadd.f32 %v127_v40, %v50_v39 }
  0xd4   :  { %v129_v45 = vpop.f32.mrf.mxu0 }
  0xd5   :  { %v326_v42 = vmul.f32 -1.442695, %v128_v41  ;;  %v130_v46 = vadd.f32 %v129_v45, %v54_v44 }
  0xd7   :  { %400 = vpow2.f32 %v326_v42 }
  0xd8   :  { %402 = vtanh.f32 %v130_v46 }
  0xe4   :  { %v401_v47 = vpop.eup %400 }
  0xe5   :  { %v135_v48 = vadd.f32 1.0, %v401_v47  ;;  %v403_v49 = vpop.eup %402 }
  0xe7   :  { %404 = vrcp.f32 %v135_v48 }
  0xf4   :  { %v405_v50 = vpop.eup %404 }
  0xf5   :  { %v139_v51 = vmul.f32 %v405_v50, %v403_v49 }
  0xf7   :  { %385 = vmatmul.mubr.f32.vlgmr.msra.gmra.mxu1 %v139_v51 }
 0x1b7   :  { %v229_v57 = vpop.f32.mrf.mxu1 }
 0x1b8   :  { %v230_v58 = vadd.f32 %v327_v56, %v229_v57 }
 0x1b9   :  { %v386_v59 = vpop.f32.mrf.mxu1 }
 0x1ba   :  { %v233_v60 = vmax.f32 %v230_v58, 0.0 }
 0x1bc   :  { %396 = vmatmul.mubr.msk.f32.vlgmr.msra.gmra.mxu0 %vm245_vm2, %v233_v60 }
 0x27c   :  { %v315_v62 = vpop.f32.mrf.mxu0 }
 0x27d   :  { %v316_v63 = vadd.f32 %v328_v61, %v315_v62 }
 0x27e   :  { %v397_v0 = vpop.f32.mrf.mxu0 }
 0x27f   :  { %320 = vst.msk [vmem:[%s601_s7] sm:$0x3] %vm319_vm3, %v316_v63 }

</bundles_post_ra>
